<compile_context>
chip_gen: v6e
topology: v6e:2x2x1
jax: 0.10.0
libtpu: 0.0.40
codegen_flags: <defaults>
</compile_context>

<pallas_src>
import functools

import jax
import jax.numpy as jnp
from jax.experimental import pallas as pl
from jax.experimental.pallas import tpu as pltpu


_SQRT_2_OVER_PI = 0.7978845608028654  # sqrt(2 / pi)


def _gelu_tanh(x):
    # 0.5 * x * (1 + tanh(sqrt(2/pi) * (x + 0.044715 * x**3)))
    return 0.5 * x * (1.0 + jnp.tanh(_SQRT_2_OVER_PI * (x + 0.044715 * x * x * x)))


def _round_up(n, m):
    return ((n + m - 1) // m) * m


def _deep_nn_kernel(x_ref,
                    w1_ref, b1_ref,
                    w2_ref, b2_ref,
                    w3_ref, b3_ref,
                    w4_ref, b4_ref,
                    w5_ref, b5_ref,
                    o_ref,
                    *, shortcut_flags):
    """Fused 5-layer MLP; everything VMEM-resident, single invocation."""
    x = x_ref[...]

    w_refs = (w1_ref, w2_ref, w3_ref, w4_ref, w5_ref)
    b_refs = (b1_ref, b2_ref, b3_ref, b4_ref, b5_ref)

    for layer_idx in range(5):
        w = w_refs[layer_idx][...]
        b = b_refs[layer_idx][...]              # (1, out_pad)
        y = jnp.dot(x, w, preferred_element_type=jnp.float32) + b
        y = _gelu_tanh(y)
        # Shortcut applicability is static (depends only on layer sizes &
        # use_shortcut), baked in at trace time.
        if shortcut_flags[layer_idx]:
            x = x + y
        else:
            x = y

    o_ref[...] = x.astype(o_ref.dtype)


def prepare_params(weights, biases, *, use_shortcut):
    """One-time parameter prep: transpose, pad to 128-lane multiples.

    weights[i]: (out_i, in_i) PyTorch layout; biases[i]: (out_i,).
    """
    assert len(weights) == 5 and len(biases) == 5
    wts, bss, flags = [], [], []
    for w, b in zip(weights, biases):
        w = jnp.asarray(w, jnp.float32)
        b = jnp.asarray(b, jnp.float32)
        out_f, in_f = w.shape
        flags.append(bool(use_shortcut) and (in_f == out_f))
        in_p = _round_up(in_f, 128)
        out_p = _round_up(out_f, 128)
        wt = jnp.pad(w.T, ((0, in_p - in_f), (0, out_p - out_f)))       # (in_p, out_p)
        bp = jnp.pad(b.reshape(1, -1), ((0, 0), (0, out_p - out_f)))    # (1, out_p)
        wts.append(wt)
        bss.append(bp)
    return {
        "weights": tuple(wts),
        "biases": tuple(bss),
        "shortcut_flags": tuple(flags),
        "in_dim": int(weights[0].shape[1]),
        "out_dim": int(weights[-1].shape[0]),
    }


def make_forward_fn(params):
    """Builds a jitted forward closing over the prepared (padded) parameters."""
    wts = params["weights"]
    bss = params["biases"]
    flags = params["shortcut_flags"]
    in_dim = params["in_dim"]
    out_dim = params["out_dim"]
    in_pad = wts[0].shape[0]
    out_pad = wts[-1].shape[1]

    kernel = functools.partial(_deep_nn_kernel, shortcut_flags=flags)
    vmem_spec = pl.BlockSpec(memory_space=pltpu.MemorySpace.VMEM)

    param_arrays = []
    for w, b in zip(wts, bss):
        param_arrays += [w, b]
    n_inputs = 1 + len(param_arrays)

    @jax.jit
    def forward(x):
        x = jnp.asarray(x, jnp.float32)
        B = x.shape[0]
        assert x.shape[1] == in_dim
        B_pad = _round_up(B, 8)
        x_pad = jnp.pad(x, ((0, B_pad - B), (0, in_pad - in_dim)))

        out_padded = pl.pallas_call(
            kernel,
            out_shape=jax.ShapeDtypeStruct((B_pad, out_pad), jnp.float32),
            in_specs=[vmem_spec] * n_inputs,
            out_specs=vmem_spec,
        )(x_pad, *param_arrays)

        return out_padded[:B, :out_dim].astype(x.dtype)

    return forward


def _reference_forward(x, weights, biases, *, use_shortcut):
    """Pure-JAX reference mirroring the PyTorch module."""
    h = jnp.asarray(x, jnp.float32)
    for w, b in zip(weights, biases):
        y = _gelu_tanh(h @ jnp.asarray(w, jnp.float32).T + jnp.asarray(b, jnp.float32))
        if use_shortcut and h.shape == y.shape:
            h = h + y
        else:
            h = y
    return h.astype(x.dtype)


if __name__ == "__main__":
    # layer_sizes: first/last differ so both shortcut and non-shortcut branches run.
    layer_sizes = [32, 64, 64, 64, 64, 32]
    use_shortcut = True
    batch = 8

    key = jax.random.PRNGKey(0)
    keys = jax.random.split(key, 11)

    x = jax.random.normal(keys[0], (batch, layer_sizes[0]), dtype=jnp.float32)

    weights = []
    biases = []
    for i in range(5):
        fan_in = layer_sizes[i]
        fan_out = layer_sizes[i + 1]
        bound = 1.0 / (fan_in ** 0.5)
        w = jax.random.uniform(keys[1 + 2 * i], (fan_out, fan_in),
                               minval=-bound, maxval=bound, dtype=jnp.float32)
        b = jax.random.uniform(keys[2 + 2 * i], (fan_out,),
                               minval=-bound, maxval=bound, dtype=jnp.float32)
        weights.append(w)
        biases.append(b)

    # One-time parameter preparation (transpose + 128-lane zero padding).
    params = prepare_params(weights, biases, use_shortcut=use_shortcut)
    forward = make_forward_fn(params)

    out = forward(x)
    out = jax.block_until_ready(out)

    ref = _reference_forward(x, weights, biases, use_shortcut=use_shortcut)
    assert out.shape == (batch, layer_sizes[-1]), out.shape
    assert jnp.allclose(out, ref, atol=1e-5, rtol=1e-5), float(jnp.max(jnp.abs(out - ref)))

    print("KERNEL_OK")
</pallas_src>

<mosaic_0001>
module attributes {stable_mosaic.version = 11 : i64} {
  func.func @_deep_nn_kernel(%arg0: memref<8x128xf32, #tpu.memory_space<vmem>>, %arg1: memref<128x128xf32, #tpu.memory_space<vmem>>, %arg2: memref<1x128xf32, #tpu.memory_space<vmem>>, %arg3: memref<128x128xf32, #tpu.memory_space<vmem>>, %arg4: memref<1x128xf32, #tpu.memory_space<vmem>>, %arg5: memref<128x128xf32, #tpu.memory_space<vmem>>, %arg6: memref<1x128xf32, #tpu.memory_space<vmem>>, %arg7: memref<128x128xf32, #tpu.memory_space<vmem>>, %arg8: memref<1x128xf32, #tpu.memory_space<vmem>>, %arg9: memref<128x128xf32, #tpu.memory_space<vmem>>, %arg10: memref<1x128xf32, #tpu.memory_space<vmem>>, %arg11: memref<8x128xf32, #tpu.memory_space<vmem>>) attributes {dimension_semantics = [], scalar_prefetch = 0 : i64, scratch_operands = 0 : i64, tpu.core_type = #tpu.core_type<tc>} {
    %c0 = arith.constant 0 : index
    %c0_0 = arith.constant 0 : index
    %0 = vector.load %arg0[%c0, %c0_0] : memref<8x128xf32, #tpu.memory_space<vmem>>, vector<8x128xf32>
    %c0_1 = arith.constant 0 : index
    %c0_2 = arith.constant 0 : index
    %1 = vector.load %arg1[%c0_1, %c0_2] : memref<128x128xf32, #tpu.memory_space<vmem>>, vector<128x128xf32>
    %c0_3 = arith.constant 0 : index
    %c0_4 = arith.constant 0 : index
    %2 = vector.load %arg2[%c0_3, %c0_4] : memref<1x128xf32, #tpu.memory_space<vmem>>, vector<1x128xf32>
    %cst = arith.constant dense<0.000000e+00> : vector<8x128xf32>
    %3 = tpu.matmul %0, %1, %cst {dimension_numbers = #tpu.dot_dimension_numbers<[1], [0], [0], [1], [0, 0, 1, 1], [], []>} : vector<8x128xf32>, vector<128x128xf32>, vector<8x128xf32> -> vector<8x128xf32>
    %4 = vector.broadcast %2 : vector<1x128xf32> to vector<8x128xf32>
    %5 = arith.addf %3, %4 : vector<8x128xf32>
    %cst_5 = arith.constant 5.000000e-01 : f32
    %6 = vector.broadcast %cst_5 : f32 to vector<8x128xf32>
    %7 = arith.mulf %6, %5 : vector<8x128xf32>
    %cst_6 = arith.constant 4.471500e-02 : f32
    %8 = vector.broadcast %cst_6 : f32 to vector<8x128xf32>
    %9 = arith.mulf %8, %5 : vector<8x128xf32>
    %10 = arith.mulf %9, %5 : vector<8x128xf32>
    %11 = arith.mulf %10, %5 : vector<8x128xf32>
    %12 = arith.addf %5, %11 : vector<8x128xf32>
    %cst_7 = arith.constant 0.797884583 : f32
    %13 = vector.broadcast %cst_7 : f32 to vector<8x128xf32>
    %14 = arith.mulf %13, %12 : vector<8x128xf32>
    %15 = math.tanh %14 : vector<8x128xf32>
    %cst_8 = arith.constant 1.000000e+00 : f32
    %16 = vector.broadcast %cst_8 : f32 to vector<8x128xf32>
    %17 = arith.addf %16, %15 : vector<8x128xf32>
    %18 = arith.mulf %7, %17 : vector<8x128xf32>
    %c0_9 = arith.constant 0 : index
    %c0_10 = arith.constant 0 : index
    %19 = vector.load %arg3[%c0_9, %c0_10] : memref<128x128xf32, #tpu.memory_space<vmem>>, vector<128x128xf32>
    %c0_11 = arith.constant 0 : index
    %c0_12 = arith.constant 0 : index
    %20 = vector.load %arg4[%c0_11, %c0_12] : memref<1x128xf32, #tpu.memory_space<vmem>>, vector<1x128xf32>
    %cst_13 = arith.constant dense<0.000000e+00> : vector<8x128xf32>
    %21 = tpu.matmul %18, %19, %cst_13 {dimension_numbers = #tpu.dot_dimension_numbers<[1], [0], [0], [1], [0, 0, 1, 1], [], []>} : vector<8x128xf32>, vector<128x128xf32>, vector<8x128xf32> -> vector<8x128xf32>
    %22 = vector.broadcast %20 : vector<1x128xf32> to vector<8x128xf32>
    %23 = arith.addf %21, %22 : vector<8x128xf32>
    %cst_14 = arith.constant 5.000000e-01 : f32
    %24 = vector.broadcast %cst_14 : f32 to vector<8x128xf32>
    %25 = arith.mulf %24, %23 : vector<8x128xf32>
    %cst_15 = arith.constant 4.471500e-02 : f32
    %26 = vector.broadcast %cst_15 : f32 to vector<8x128xf32>
    %27 = arith.mulf %26, %23 : vector<8x128xf32>
    %28 = arith.mulf %27, %23 : vector<8x128xf32>
    %29 = arith.mulf %28, %23 : vector<8x128xf32>
    %30 = arith.addf %23, %29 : vector<8x128xf32>
    %cst_16 = arith.constant 0.797884583 : f32
    %31 = vector.broadcast %cst_16 : f32 to vector<8x128xf32>
    %32 = arith.mulf %31, %30 : vector<8x128xf32>
    %33 = math.tanh %32 : vector<8x128xf32>
    %cst_17 = arith.constant 1.000000e+00 : f32
    %34 = vector.broadcast %cst_17 : f32 to vector<8x128xf32>
    %35 = arith.addf %34, %33 : vector<8x128xf32>
    %36 = arith.mulf %25, %35 : vector<8x128xf32>
    %37 = arith.addf %18, %36 : vector<8x128xf32>
    %c0_18 = arith.constant 0 : index
    %c0_19 = arith.constant 0 : index
    %38 = vector.load %arg5[%c0_18, %c0_19] : memref<128x128xf32, #tpu.memory_space<vmem>>, vector<128x128xf32>
    %c0_20 = arith.constant 0 : index
    %c0_21 = arith.constant 0 : index
    %39 = vector.load %arg6[%c0_20, %c0_21] : memref<1x128xf32, #tpu.memory_space<vmem>>, vector<1x128xf32>
    %cst_22 = arith.constant dense<0.000000e+00> : vector<8x128xf32>
    %40 = tpu.matmul %37, %38, %cst_22 {dimension_numbers = #tpu.dot_dimension_numbers<[1], [0], [0], [1], [0, 0, 1, 1], [], []>} : vector<8x128xf32>, vector<128x128xf32>, vector<8x128xf32> -> vector<8x128xf32>
    %41 = vector.broadcast %39 : vector<1x128xf32> to vector<8x128xf32>
    %42 = arith.addf %40, %41 : vector<8x128xf32>
    %cst_23 = arith.constant 5.000000e-01 : f32
    %43 = vector.broadcast %cst_23 : f32 to vector<8x128xf32>
    %44 = arith.mulf %43, %42 : vector<8x128xf32>
    %cst_24 = arith.constant 4.471500e-02 : f32
    %45 = vector.broadcast %cst_24 : f32 to vector<8x128xf32>
    %46 = arith.mulf %45, %42 : vector<8x128xf32>
    %47 = arith.mulf %46, %42 : vector<8x128xf32>
    %48 = arith.mulf %47, %42 : vector<8x128xf32>
    %49 = arith.addf %42, %48 : vector<8x128xf32>
    %cst_25 = arith.constant 0.797884583 : f32
    %50 = vector.broadcast %cst_25 : f32 to vector<8x128xf32>
    %51 = arith.mulf %50, %49 : vector<8x128xf32>
    %52 = math.tanh %51 : vector<8x128xf32>
    %cst_26 = arith.constant 1.000000e+00 : f32
    %53 = vector.broadcast %cst_26 : f32 to vector<8x128xf32>
    %54 = arith.addf %53, %52 : vector<8x128xf32>
    %55 = arith.mulf %44, %54 : vector<8x128xf32>
    %56 = arith.addf %37, %55 : vector<8x128xf32>
    %c0_27 = arith.constant 0 : index
    %c0_28 = arith.constant 0 : index
    %57 = vector.load %arg7[%c0_27, %c0_28] : memref<128x128xf32, #tpu.memory_space<vmem>>, vector<128x128xf32>
    %c0_29 = arith.constant 0 : index
    %c0_30 = arith.constant 0 : index
    %58 = vector.load %arg8[%c0_29, %c0_30] : memref<1x128xf32, #tpu.memory_space<vmem>>, vector<1x128xf32>
    %cst_31 = arith.constant dense<0.000000e+00> : vector<8x128xf32>
    %59 = tpu.matmul %56, %57, %cst_31 {dimension_numbers = #tpu.dot_dimension_numbers<[1], [0], [0], [1], [0, 0, 1, 1], [], []>} : vector<8x128xf32>, vector<128x128xf32>, vector<8x128xf32> -> vector<8x128xf32>
    %60 = vector.broadcast %58 : vector<1x128xf32> to vector<8x128xf32>
    %61 = arith.addf %59, %60 : vector<8x128xf32>
    %cst_32 = arith.constant 5.000000e-01 : f32
    %62 = vector.broadcast %cst_32 : f32 to vector<8x128xf32>
    %63 = arith.mulf %62, %61 : vector<8x128xf32>
    %cst_33 = arith.constant 4.471500e-02 : f32
    %64 = vector.broadcast %cst_33 : f32 to vector<8x128xf32>
    %65 = arith.mulf %64, %61 : vector<8x128xf32>
    %66 = arith.mulf %65, %61 : vector<8x128xf32>
    %67 = arith.mulf %66, %61 : vector<8x128xf32>
    %68 = arith.addf %61, %67 : vector<8x128xf32>
    %cst_34 = arith.constant 0.797884583 : f32
    %69 = vector.broadcast %cst_34 : f32 to vector<8x128xf32>
    %70 = arith.mulf %69, %68 : vector<8x128xf32>
    %71 = math.tanh %70 : vector<8x128xf32>
    %cst_35 = arith.constant 1.000000e+00 : f32
    %72 = vector.broadcast %cst_35 : f32 to vector<8x128xf32>
    %73 = arith.addf %72, %71 : vector<8x128xf32>
    %74 = arith.mulf %63, %73 : vector<8x128xf32>
    %75 = arith.addf %56, %74 : vector<8x128xf32>
    %c0_36 = arith.constant 0 : index
    %c0_37 = arith.constant 0 : index
    %76 = vector.load %arg9[%c0_36, %c0_37] : memref<128x128xf32, #tpu.memory_space<vmem>>, vector<128x128xf32>
    %c0_38 = arith.constant 0 : index
    %c0_39 = arith.constant 0 : index
    %77 = vector.load %arg10[%c0_38, %c0_39] : memref<1x128xf32, #tpu.memory_space<vmem>>, vector<1x128xf32>
    %cst_40 = arith.constant dense<0.000000e+00> : vector<8x128xf32>
    %78 = tpu.matmul %75, %76, %cst_40 {dimension_numbers = #tpu.dot_dimension_numbers<[1], [0], [0], [1], [0, 0, 1, 1], [], []>} : vector<8x128xf32>, vector<128x128xf32>, vector<8x128xf32> -> vector<8x128xf32>
    %79 = vector.broadcast %77 : vector<1x128xf32> to vector<8x128xf32>
    %80 = arith.addf %78, %79 : vector<8x128xf32>
    %cst_41 = arith.constant 5.000000e-01 : f32
    %81 = vector.broadcast %cst_41 : f32 to vector<8x128xf32>
    %82 = arith.mulf %81, %80 : vector<8x128xf32>
    %cst_42 = arith.constant 4.471500e-02 : f32
    %83 = vector.broadcast %cst_42 : f32 to vector<8x128xf32>
    %84 = arith.mulf %83, %80 : vector<8x128xf32>
    %85 = arith.mulf %84, %80 : vector<8x128xf32>
    %86 = arith.mulf %85, %80 : vector<8x128xf32>
    %87 = arith.addf %80, %86 : vector<8x128xf32>
    %cst_43 = arith.constant 0.797884583 : f32
    %88 = vector.broadcast %cst_43 : f32 to vector<8x128xf32>
    %89 = arith.mulf %88, %87 : vector<8x128xf32>
    %90 = math.tanh %89 : vector<8x128xf32>
    %cst_44 = arith.constant 1.000000e+00 : f32
    %91 = vector.broadcast %cst_44 : f32 to vector<8x128xf32>
    %92 = arith.addf %91, %90 : vector<8x128xf32>
    %93 = arith.mulf %82, %92 : vector<8x128xf32>
    %c0_45 = arith.constant 0 : index
    %c0_46 = arith.constant 0 : index
    %94 = vector.load %arg11[%c0_45, %c0_46] : memref<8x128xf32, #tpu.memory_space<vmem>>, vector<8x128xf32>
    tpu.vector_store %arg11[%c0_45, %c0_46], %93 {strides = array<i32>} : memref<8x128xf32, #tpu.memory_space<vmem>>, vector<8x128xf32>,
    return
  }
}

</mosaic_0001>

<bundles_post_ra>
// kernel: forward.1
= control target key start
LH: loop header
LB: loop body
LE: loop exit
PB: predicated region body
PF: predicated region fallthrough
CT: control target
= control target key end

     0   :  { %16 = vsyncpa [#allocation3], 0  ;;  %s1275_s0 = inlined_call_operand.vmem [shape: f32[8,128], index: 0, kind: input, shape index: {}]   ;;  %s1276_s1 = inlined_call_operand.hbm [shape: f32[128,128], index: 1, kind: input, shape index: {}]   ;;  %s1277_s2 = inlined_call_operand.vmem [shape: f32[1,128], index: 2, kind: input, shape index: {}]   ;;  %s1278_s3 = inlined_call_operand.hbm [shape: f32[128,128], index: 3, kind: input, shape index: {}]   ;;  %s1279_s4 = inlined_call_operand.vmem [shape: f32[1,128], index: 4, kind: input, shape index: {}]   ;;  %s1280_s5 = inlined_call_operand.hbm [shape: f32[128,128], index: 5, kind: input, shape index: {}]   ;;  %s1281_s6 = inlined_call_operand.vmem [shape: f32[1,128], index: 6, kind: input, shape index: {}]   ;;  %s1282_s7 = inlined_call_operand.hbm [shape: f32[128,128], index: 7, kind: input, shape index: {}]   ;;  %s1283_s8 = inlined_call_operand.vmem [shape: f32[1,128], index: 8, kind: input, shape index: {}]   ;;  %s1284_s9 = inlined_call_operand.hbm [shape: f32[128,128], index: 9, kind: input, shape index: {}]   ;;  %s1285_s10 = inlined_call_operand.vmem [shape: f32[1,128], index: 10, kind: input, shape index: {}]   ;;  %s1286_s11 = inlined_call_operand.hbm [shape: f32[8,128], index: 11, kind: output, shape index: {}]  }
   0x1   :  { %17 = vsyncpa [#allocation6], 0 }
   0x2   :  { %18 = vsyncpa [#allocation9], 0 }
   0x3   :  { %19 = vsyncpa [#allocation4], 0  ;;  %s1052_s17 = smov [#allocation5]   ;;  %s1053_s19 = smov [#allocation8]  }
   0x4   :  { %s41_s18 = sshll.u32 %s1052_s17, 4  ;;  %s69_s20 = sshll.u32 %s1053_s19, 4  ;;  %s42_s18 = int_to_ptr.vmem [resolvable:$true] %s41_s18  ;;  %s70_s20 = int_to_ptr.vmem [resolvable:$true] %s69_s20 }
   0x5   :  { %s932_s21 = scalar_lea.vmem %s42_s18, 2048  ;;  %p937_p1 = scmp.lt.s32.totalorder %s42_s18, %s42_s18 }
   0x6   :  { %p933_p0 = scmp.ne.s32.totalorder %s42_s18, %s932_s21  ;;  %p938_p2 = scmp.lt.s32.totalorder %s932_s21, %s932_s21 }
   0x8   :  { %p939_p3 = por %p938_p2, %p937_p1 }
   0xa   :  { %p940_p4 = pnand %p939_p3, %p933_p0 }
   0xc   :  { %943 = shalt.err (!%p940_p4)
}
   0xd   :  { %s1054_s22 = smov 128   ;;  %s1055_s23 = smov 8  }
   0xe   :  { %47 = dma.hbm_to_vmem [thread:$0]  %s1278_s3, 2048, %s42_s18, [#allocation6], %s1054_s22, %s1054_s22, %s1055_s23  }
   0xf   :  { %s952_s26 = scalar_lea.vmem %s70_s20, 2048  ;;  %p957_p6 = scmp.lt.s32.totalorder %s70_s20, %s70_s20 }
  0x10   :  { %p953_p5 = scmp.ne.s32.totalorder %s70_s20, %s952_s26  ;;  %p958_p7 = scmp.lt.s32.totalorder %s952_s26, %s952_s26 }
  0x12   :  { %p959_p8 = por %p958_p7, %p957_p6 }
  0x14   :  { %p960_p9 = pnand %p959_p8, %p953_p5 }
  0x16   :  { %963 = shalt.err (!%p960_p9)
}
  0x17   :  { %75 = dma.hbm_to_vmem [thread:$0]  %s1282_s7, 2048, %s70_s20, [#allocation9], %s1054_s22, %s1054_s22, %s1055_s23  }
  0x18   :  { %s1056_s29 = smov [#allocation2]   ;;  %s1057_s12 = smov [#allocation7]  }
  0x19   :  { %s27_s30 = sshll.u32 %s1056_s29, 4  ;;  %s55_s13 = sshll.u32 %s1057_s12, 4  ;;  %s28_s30 = int_to_ptr.vmem [resolvable:$true] %s27_s30  ;;  %s56_s13 = int_to_ptr.vmem [resolvable:$true] %s55_s13 }
  0x1a   :  { %s972_s3 = scalar_lea.vmem %s28_s30, 2048  ;;  %p977_p11 = scmp.lt.s32.totalorder %s28_s30, %s28_s30 }
  0x1b   :  { %p973_p10 = scmp.ne.s32.totalorder %s28_s30, %s972_s3  ;;  %p978_p12 = scmp.lt.s32.totalorder %s972_s3, %s972_s3 }
  0x1d   :  { %p979_p13 = por %p978_p12, %p977_p11 }
  0x1f   :  { %p980_p0 = pnand %p979_p13, %p973_p10 }
  0x21   :  { %983 = shalt.err (!%p980_p0)
}
  0x22   :  { %33 = dma.hbm_to_vmem [thread:$0]  %s1276_s1, 2048, %s28_s30, [#allocation3], %s1054_s22, %s1054_s22, %s1055_s23  }
  0x23   :  { %s992_s7 = scalar_lea.vmem %s56_s13, 2048  ;;  %p997_p2 = scmp.lt.s32.totalorder %s56_s13, %s56_s13 }
  0x24   :  { %p993_p1 = scmp.ne.s32.totalorder %s56_s13, %s992_s7  ;;  %p998_p3 = scmp.lt.s32.totalorder %s992_s7, %s992_s7 }
  0x26   :  { %p999_p4 = por %p998_p3, %p997_p2 }
  0x28   :  { %p1000_p5 = pnand %p999_p4, %p993_p1 }
  0x2a   :  { %1003 = shalt.err (!%p1000_p5)
}
  0x2b   :  { %61 = dma.hbm_to_vmem [thread:$0]  %s1280_s5, 2048, %s56_s13, [#allocation6], %s1054_s22, %s1054_s22, %s1055_s23  }
  0x2c   :  { %s1058_s18 = smov [#allocation10]  }
  0x2d   :  { %s83_s19 = sshll.u32 %s1058_s18, 4  ;;  %s84_s19 = int_to_ptr.vmem [resolvable:$true] %s83_s19 }
  0x2e   :  { %s1012_s20 = scalar_lea.vmem %s84_s19, 2048  ;;  %p1017_p7 = scmp.lt.s32.totalorder %s84_s19, %s84_s19 }
  0x2f   :  { %p1013_p6 = scmp.ne.s32.totalorder %s84_s19, %s1012_s20  ;;  %p1018_p8 = scmp.lt.s32.totalorder %s1012_s20, %s1012_s20 }
  0x31   :  { %p1019_p9 = por %p1018_p8, %p1017_p7 }
  0x33   :  { %p1020_p10 = pnand %p1019_p9, %p1013_p6 }
  0x35   :  { %1023 = shalt.err (!%p1020_p10)
}
  0x36   :  { %89 = dma.hbm_to_vmem [thread:$0]  %s1284_s9, 2048, %s84_s19, [#allocation9], %s1054_s22, %s1054_s22, %s1055_s23  }
  0x37   :  { %1044 = dma.done.wait [#allocation3], 2048  }
  0x38   :  { %1045 = vsyncadd [#allocation3], 4294965248 }
  0x39   :  { %1046 = dma.done.wait [#allocation6], 4096  }
  0x3a   :  { %1047 = vsyncadd [#allocation6], 4294963200 }
  0x3b   :  { %1048 = dma.done.wait [#allocation9], 4096  }
  0x3c   :  { %1049 = vsyncadd [#allocation9], 4294963200  ;;  %v1059_v0 = vmov 0.0   ;;  %vm1060_vm0 = vmmov 0   ;;  %v123_v1 = vld [vmem:[#allocation2 + $0x78] sm:$0xff]  ;;  %v122_v2 = vld [vmem:[#allocation2 + $0x70] sm:$0xff] }
  0x3d   :  { %729 = vmatprep.subr.mxu0 %v1059_v0  ;;  %761 = vmatprep.mubr.msk.f32.mxu0 %vm1060_vm0, %v1059_v0  ;;  %v121_v3 = vld [vmem:[#allocation2 + $0x68] sm:$0xff]  ;;  %v120_v4 = vld [vmem:[#allocation2 + $0x60] sm:$0xff]  ;;  %v119_v5 = vld [vmem:[#allocation2 + $0x58] sm:$0xff] }
  0x3e   :  { %764 = vmatprep.subr.mxu1 %v1059_v0  ;;  %796 = vmatprep.mubr.msk.f32.mxu1 %vm1060_vm0, %v1059_v0  ;;  %v118_v6 = vld [vmem:[#allocation2 + $0x50] sm:$0xff]  ;;  %v117_v7 = vld [vmem:[#allocation2 + $0x48] sm:$0xff]  ;;  %v116_v8 = vld [vmem:[#allocation2 + $0x40] sm:$0xff] }
  0x3f   :  { %730 = vmatpush3.msra.mxu0 %v123_v1  ;;  %v115_v9 = vld [vmem:[#allocation2 + $0x38] sm:$0xff]  ;;  %v114_v10 = vld [vmem:[#allocation2 + $0x30] sm:$0xff]  ;;  %v113_v11 = vld [vmem:[#allocation2 + $0x28] sm:$0xff] }
  0x40   :  { %731 = vmatprep.subr.mxu0 %v1059_v0  ;;  %v112_v12 = vld [vmem:[#allocation2 + $0x20] sm:$0xff]  ;;  %v111_v13 = vld [vmem:[#allocation2 + $0x18] sm:$0xff]  ;;  %v110_v14 = vld [vmem:[#allocation2 + $0x10] sm:$0xff] }
  0x41   :  { %732 = vmatpush3.msra.mxu0 %v122_v2  ;;  %v109_v15 = vld [vmem:[#allocation2 + $0x8] sm:$0xff]  ;;  %v108_v16 = vld [vmem:[#allocation2] sm:$0xff]  ;;  %v225_v18 = vld [vmem:[#allocation5 + $0x78] sm:$0xff] }
  0x42   :  { %733 = vmatprep.subr.mxu0 %v1059_v0  ;;  %v107_v17 = vld [vmem:[%s1275_s0] sm:$0xff]  ;;  %765 = vmatpush3.msra.mxu1 %v225_v18  ;;  %v224_v19 = vld [vmem:[#allocation5 + $0x70] sm:$0xff]  ;;  %v223_v20 = vld [vmem:[#allocation5 + $0x68] sm:$0xff] }
  0x43   :  { %734 = vmatpush3.msra.mxu0 %v121_v3  ;;  %766 = vmatprep.subr.mxu1 %v1059_v0  ;;  %v222_v21 = vld [vmem:[#allocation5 + $0x60] sm:$0xff]  ;;  %v221_v22 = vld [vmem:[#allocation5 + $0x58] sm:$0xff]  ;;  %v220_v23 = vld [vmem:[#allocation5 + $0x50] sm:$0xff] }
  0x44   :  { %735 = vmatprep.subr.mxu0 %v1059_v0  ;;  %767 = vmatpush3.msra.mxu1 %v224_v19  ;;  %v219_v24 = vld [vmem:[#allocation5 + $0x48] sm:$0xff]  ;;  %v218_v25 = vld [vmem:[#allocation5 + $0x40] sm:$0xff]  ;;  %v217_v26 = vld [vmem:[#allocation5 + $0x38] sm:$0xff] }
  0x45   :  { %736 = vmatpush3.msra.mxu0 %v120_v4  ;;  %768 = vmatprep.subr.mxu1 %v1059_v0  ;;  %v216_v27 = vld [vmem:[#allocation5 + $0x30] sm:$0xff]  ;;  %v215_v28 = vld [vmem:[#allocation5 + $0x28] sm:$0xff]  ;;  %v214_v29 = vld [vmem:[#allocation5 + $0x20] sm:$0xff] }
  0x46   :  { %737 = vmatprep.subr.mxu0 %v1059_v0  ;;  %769 = vmatpush3.msra.mxu1 %v223_v20  ;;  %v213_v30 = vld [vmem:[#allocation5 + $0x18] sm:$0xff]  ;;  %v212_v31 = vld [vmem:[#allocation5 + $0x10] sm:$0xff]  ;;  %v211_v32 = vld [vmem:[#allocation5 + $0x8] sm:$0xff] }
  0x47   :  { %738 = vmatpush3.msra.mxu0 %v119_v5  ;;  %770 = vmatprep.subr.mxu1 %v1059_v0  ;;  %v210_v33 = vld [vmem:[#allocation5] sm:$0xff]  ;;  %v328_v47 = vld [vmem:[#allocation7 + $0x78] sm:$0xff]  ;;  %v327_v48 = vld [vmem:[#allocation7 + $0x70] sm:$0xff] }
  0x48   :  { %739 = vmatprep.subr.mxu0 %v1059_v0  ;;  %771 = vmatpush3.msra.mxu1 %v222_v21  ;;  %v639_v34 = vld [vmem:[%s1277_s2] ss:$0 sm:$0xff]  ;;  %v326_v49 = vld [vmem:[#allocation7 + $0x68] sm:$0xff]  ;;  %v324_v51 = vld [vmem:[#allocation7 + $0x58] sm:$0xff] }
  0x49   :  { %740 = vmatpush3.msra.mxu0 %v118_v6  ;;  %772 = vmatprep.subr.mxu1 %v1059_v0  ;;  %v325_v50 = vld [vmem:[#allocation7 + $0x60] sm:$0xff]  ;;  %v323_v52 = vld [vmem:[#allocation7 + $0x50] sm:$0xff]  ;;  %v322_v53 = vld [vmem:[#allocation7 + $0x48] sm:$0xff] }
  0x4a   :  { %741 = vmatprep.subr.mxu0 %v1059_v0  ;;  %773 = vmatpush3.msra.mxu1 %v221_v22  ;;  %v321_v54 = vld [vmem:[#allocation7 + $0x40] sm:$0xff]  ;;  %v320_v55 = vld [vmem:[#allocation7 + $0x38] sm:$0xff]  ;;  %v319_v56 = vld [vmem:[#allocation7 + $0x30] sm:$0xff] }
  0x4b   :  { %742 = vmatpush3.msra.mxu0 %v117_v7  ;;  %774 = vmatprep.subr.mxu1 %v1059_v0  ;;  %v318_v57 = vld [vmem:[#allocation7 + $0x28] sm:$0xff]  ;;  %v317_v58 = vld [vmem:[#allocation7 + $0x20] sm:$0xff]  ;;  %v316_v59 = vld [vmem:[#allocation7 + $0x18] sm:$0xff] }
  0x4c   :  { %743 = vmatprep.subr.mxu0 %v1059_v0  ;;  %775 = vmatpush3.msra.mxu1 %v220_v23  ;;  %v315_v60 = vld [vmem:[#allocation7 + $0x10] sm:$0xff]  ;;  %v314_v61 = vld [vmem:[#allocation7 + $0x8] sm:$0xff]  ;;  %v313_v62 = vld [vmem:[#allocation7] sm:$0xff] }
  0x4d   :  { %744 = vmatpush3.msra.mxu0 %v116_v8  ;;  %776 = vmatprep.subr.mxu1 %v1059_v0  ;;  %v640_v63 = vld [vmem:[%s1279_s4] ss:$0 sm:$0xff]  ;;  %v427_v18 = vld [vmem:[#allocation8 + $0x58] sm:$0xff]  ;;  %v426_v19 = vld [vmem:[#allocation8 + $0x50] sm:$0xff] }
  0x4e   :  { %745 = vmatprep.subr.mxu0 %v1059_v0  ;;  %777 = vmatpush3.msra.mxu1 %v219_v24  ;;  %v425_v20 = vld [vmem:[#allocation8 + $0x48] sm:$0xff]  ;;  %v424_v21 = vld [vmem:[#allocation8 + $0x40] sm:$0xff]  ;;  %v423_v22 = vld [vmem:[#allocation8 + $0x38] sm:$0xff] }
  0x4f   :  { %746 = vmatpush3.msra.mxu0 %v115_v9  ;;  %778 = vmatprep.subr.mxu1 %v1059_v0  ;;  %v422_v23 = vld [vmem:[#allocation8 + $0x30] sm:$0xff]  ;;  %v421_v24 = vld [vmem:[#allocation8 + $0x28] sm:$0xff] }
  0x50   :  { %747 = vmatprep.subr.mxu0 %v1059_v0  ;;  %779 = vmatpush3.msra.mxu1 %v218_v25  ;;  %v420_v25 = vld [vmem:[#allocation8 + $0x20] sm:$0xff] }
  0x51   :  { %748 = vmatpush3.msra.mxu0 %v114_v10  ;;  %780 = vmatprep.subr.mxu1 %v1059_v0 }
  0x52   :  { %749 = vmatprep.subr.mxu0 %v1059_v0  ;;  %781 = vmatpush3.msra.mxu1 %v217_v26  ;;  %v419_v26 = vld [vmem:[#allocation8 + $0x18] sm:$0xff] }
  0x53   :  { %750 = vmatpush3.msra.mxu0 %v113_v11  ;;  %782 = vmatprep.subr.mxu1 %v1059_v0 }
  0x54   :  { %751 = vmatprep.subr.mxu0 %v1059_v0  ;;  %783 = vmatpush3.msra.mxu1 %v216_v27  ;;  %v418_v27 = vld [vmem:[#allocation8 + $0x10] sm:$0xff] }
  0x55   :  { %752 = vmatpush3.msra.mxu0 %v112_v12  ;;  %784 = vmatprep.subr.mxu1 %v1059_v0 }
  0x56   :  { %753 = vmatprep.subr.mxu0 %v1059_v0  ;;  %785 = vmatpush3.msra.mxu1 %v215_v28  ;;  %v417_v28 = vld [vmem:[#allocation8 + $0x8] sm:$0xff] }
  0x57   :  { %754 = vmatpush3.msra.mxu0 %v111_v13  ;;  %786 = vmatprep.subr.mxu1 %v1059_v0 }
  0x58   :  { %755 = vmatprep.subr.mxu0 %v1059_v0  ;;  %787 = vmatpush3.msra.mxu1 %v214_v29  ;;  %v416_v29 = vld [vmem:[#allocation8] sm:$0xff] }
  0x59   :  { %756 = vmatpush3.msra.mxu0 %v110_v14  ;;  %788 = vmatprep.subr.mxu1 %v1059_v0  ;;  %v431_v14 = vld [vmem:[#allocation8 + $0x78] sm:$0xff] }
  0x5a   :  { %757 = vmatprep.subr.mxu0 %v1059_v0  ;;  %789 = vmatpush3.msra.mxu1 %v213_v30  ;;  %v641_v30 = vld [vmem:[%s1281_s6] ss:$0 sm:$0xff] }
  0x5b   :  { %758 = vmatpush3.msra.mxu0 %v109_v15  ;;  %790 = vmatprep.subr.mxu1 %v1059_v0  ;;  %v430_v15 = vld [vmem:[#allocation8 + $0x70] sm:$0xff] }
  0x5c   :  { %759 = vmatprep.subr.mxu0 %v1059_v0  ;;  %791 = vmatpush3.msra.mxu1 %v212_v31 }
  0x5d   :  { %760 = vmatpush3.msra.mxu0 %v108_v16  ;;  %792 = vmatprep.subr.mxu1 %v1059_v0  ;;  %v429_v16 = vld [vmem:[#allocation8 + $0x68] sm:$0xff] }
  0x5e   :  { %762 = vmatmul.mubr.f32.vlgmr.msra.gmra.mxu0 %v107_v17  ;;  %799 = vmatprep.subr.mxu0 %v1059_v0  ;;  %v428_v17 = vld [vmem:[#allocation8 + $0x60] sm:$0xff] }
  0x5f   :  { %831 = vmatprep.mubr.msk.f32.mxu0 %vm1060_vm0, %v1059_v0  ;;  %793 = vmatpush3.msra.mxu1 %v211_v32 }
  0x60   :  { %794 = vmatprep.subr.mxu1 %v1059_v0  ;;  %800 = vmatpush3.msra.mxu0 %v328_v47  ;;  %v531_v47 = vld [vmem:[#allocation10 + $0x60] sm:$0xff] }
  0x61   :  { %795 = vmatpush3.msra.mxu1 %v210_v33  ;;  %801 = vmatprep.subr.mxu0 %v1059_v0 }
  0x62   :  { %834 = vmatprep.subr.mxu1 %v1059_v0  ;;  %802 = vmatpush3.msra.mxu0 %v327_v48  ;;  %v530_v48 = vld [vmem:[#allocation10 + $0x58] sm:$0xff] }
  0x63   :  { %803 = vmatprep.subr.mxu0 %v1059_v0 }
  0x64   :  { %804 = vmatpush3.msra.mxu0 %v326_v49  ;;  %v529_v49 = vld [vmem:[#allocation10 + $0x50] sm:$0xff] }
  0x65   :  { %805 = vmatprep.subr.mxu0 %v1059_v0 }
  0x66   :  { %806 = vmatpush3.msra.mxu0 %v325_v50  ;;  %v528_v50 = vld [vmem:[#allocation10 + $0x48] sm:$0xff] }
  0x67   :  { %807 = vmatprep.subr.mxu0 %v1059_v0 }
  0x68   :  { %808 = vmatpush3.msra.mxu0 %v324_v51  ;;  %v527_v51 = vld [vmem:[#allocation10 + $0x40] sm:$0xff] }
  0x69   :  { %809 = vmatprep.subr.mxu0 %v1059_v0 }
  0x6a   :  { %810 = vmatpush3.msra.mxu0 %v323_v52  ;;  %v526_v52 = vld [vmem:[#allocation10 + $0x38] sm:$0xff] }
  0x6b   :  { %811 = vmatprep.subr.mxu0 %v1059_v0 }
  0x6c   :  { %812 = vmatpush3.msra.mxu0 %v322_v53  ;;  %v525_v53 = vld [vmem:[#allocation10 + $0x30] sm:$0xff] }
  0x6d   :  { %813 = vmatprep.subr.mxu0 %v1059_v0 }
  0x6e   :  { %814 = vmatpush3.msra.mxu0 %v321_v54  ;;  %v524_v54 = vld [vmem:[#allocation10 + $0x28] sm:$0xff] }
  0x6f   :  { %815 = vmatprep.subr.mxu0 %v1059_v0 }
  0x70   :  { %816 = vmatpush3.msra.mxu0 %v320_v55  ;;  %v523_v55 = vld [vmem:[#allocation10 + $0x20] sm:$0xff] }
  0x71   :  { %817 = vmatprep.subr.mxu0 %v1059_v0 }
  0x72   :  { %818 = vmatpush3.msra.mxu0 %v319_v56  ;;  %v522_v56 = vld [vmem:[#allocation10 + $0x18] sm:$0xff] }
  0x73   :  { %819 = vmatprep.subr.mxu0 %v1059_v0 }
  0x74   :  { %820 = vmatpush3.msra.mxu0 %v318_v57  ;;  %v521_v57 = vld [vmem:[#allocation10 + $0x10] sm:$0xff] }
  0x75   :  { %821 = vmatprep.subr.mxu0 %v1059_v0 }
  0x76   :  { %822 = vmatpush3.msra.mxu0 %v317_v58  ;;  %v520_v58 = vld [vmem:[#allocation10 + $0x8] sm:$0xff] }
  0x77   :  { %823 = vmatprep.subr.mxu0 %v1059_v0 }
  0x78   :  { %824 = vmatpush3.msra.mxu0 %v316_v59  ;;  %v519_v59 = vld [vmem:[#allocation10] sm:$0xff] }
  0x79   :  { %825 = vmatprep.subr.mxu0 %v1059_v0 }
  0x7a   :  { %826 = vmatpush3.msra.mxu0 %v315_v60  ;;  %v642_v60 = vld [vmem:[%s1283_s8] ss:$0 sm:$0xff]  ;;  %s1061_s8 = smov [#allocation11]  }
  0x7b   :  { %827 = vmatprep.subr.mxu0 %v1059_v0  ;;  %s628_s28 = sshll.u32 %s1061_s8, 4  ;;  %s629_s28 = int_to_ptr.vmem [resolvable:$true] %s628_s28 }
  0x7c   :  { %828 = vmatpush3.msra.mxu0 %v314_v61  ;;  %s1024_s29 = scalar_lea.vmem %s629_s28, 128  ;;  %p1029_p12 = scmp.lt.s32.totalorder %s629_s28, %s629_s28 }
  0x7d   :  { %829 = vmatprep.subr.mxu0 %v1059_v0  ;;  %p1025_p11 = scmp.ne.s32.totalorder %s629_s28, %s1024_s29  ;;  %p1030_p13 = scmp.lt.s32.totalorder %s1024_s29, %s1024_s29 }
  0x7e   :  { %830 = vmatpush3.msra.mxu0 %v313_v62 }
  0x7f   :  { %869 = vmatprep.subr.mxu0 %v1059_v0  ;;  %p1031_p0 = por %p1030_p13, %p1029_p12 }
  0x81   :  { %p1032_p1 = pnand %p1031_p0, %p1025_p11 }
 0x11e   :  { %v197_v35 = vpop.f32.mrf.mxu0 }
 0x11f   :  { %v198_v36 = vadd.f32 %v639_v34, %v197_v35 }
 0x120   :  { %v763_v37 = vpop.f32.mrf.mxu0 }
 0x121   :  { %v202_v38 = vmul.f32 0.044715, %v198_v36  ;;  %v201_v44 = vmul.f32 0.5, %v198_v36 }
 0x123   :  { %v203_v39 = vmul.f32 %v202_v38, %v198_v36 }
 0x125   :  { %v204_v40 = vmul.f32 %v203_v39, %v198_v36 }
 0x127   :  { %v205_v41 = vadd.f32 %v204_v40, %v198_v36 }
 0x129   :  { %v206_v42 = vmul.f32 0.7978846, %v205_v41 }
 0x12b   :  { %914 = vtanh.f32 %v206_v42 }
 0x138   :  { %v915_v43 = vpop.eup %914 }
 0x139   :  { %v208_v45 = vadd.f32 1.0, %v915_v43 }
 0x13b   :  { %v1198_v46 = vmul.f32 %v208_v45, %v201_v44  ;;  %v534_v44 = vld [vmem:[#allocation10 + $0x78] sm:$0xff]  ;;  %v533_v45 = vld [vmem:[#allocation10 + $0x70] sm:$0xff] }
 0x13d   :  { %797 = vmatmul.mubr.f32.vlgmr.msra.gmra.mxu1 %v1198_v46 }
 0x13e   :  { %866 = vmatprep.mubr.msk.f32.mxu1 %vm1060_vm0, %v1059_v0  ;;  %835 = vmatpush3.msra.mxu1 %v431_v14 }
 0x13f   :  { %836 = vmatprep.subr.mxu1 %v1059_v0 }
 0x140   :  { %837 = vmatpush3.msra.mxu1 %v430_v15 }
 0x141   :  { %838 = vmatprep.subr.mxu1 %v1059_v0 }
 0x142   :  { %839 = vmatpush3.msra.mxu1 %v429_v16 }
 0x143   :  { %840 = vmatprep.subr.mxu1 %v1059_v0 }
 0x144   :  { %841 = vmatpush3.msra.mxu1 %v428_v17 }
 0x145   :  { %842 = vmatprep.subr.mxu1 %v1059_v0 }
 0x146   :  { %843 = vmatpush3.msra.mxu1 %v427_v18 }
 0x147   :  { %844 = vmatprep.subr.mxu1 %v1059_v0 }
 0x148   :  { %845 = vmatpush3.msra.mxu1 %v426_v19 }
 0x149   :  { %846 = vmatprep.subr.mxu1 %v1059_v0 }
 0x14a   :  { %847 = vmatpush3.msra.mxu1 %v425_v20 }
 0x14b   :  { %848 = vmatprep.subr.mxu1 %v1059_v0 }
 0x14c   :  { %849 = vmatpush3.msra.mxu1 %v424_v21 }
 0x14d   :  { %850 = vmatprep.subr.mxu1 %v1059_v0 }
 0x14e   :  { %851 = vmatpush3.msra.mxu1 %v423_v22 }
 0x14f   :  { %852 = vmatprep.subr.mxu1 %v1059_v0 }
 0x150   :  { %853 = vmatpush3.msra.mxu1 %v422_v23 }
 0x151   :  { %854 = vmatprep.subr.mxu1 %v1059_v0 }
 0x152   :  { %855 = vmatpush3.msra.mxu1 %v421_v24 }
 0x153   :  { %856 = vmatprep.subr.mxu1 %v1059_v0 }
 0x154   :  { %857 = vmatpush3.msra.mxu1 %v420_v25 }
 0x155   :  { %858 = vmatprep.subr.mxu1 %v1059_v0 }
 0x156   :  { %859 = vmatpush3.msra.mxu1 %v419_v26 }
 0x157   :  { %860 = vmatprep.subr.mxu1 %v1059_v0 }
 0x158   :  { %861 = vmatpush3.msra.mxu1 %v418_v27 }
 0x159   :  { %862 = vmatprep.subr.mxu1 %v1059_v0 }
 0x15a   :  { %863 = vmatpush3.msra.mxu1 %v417_v28 }
 0x15b   :  { %864 = vmatprep.subr.mxu1 %v1059_v0 }
 0x15c   :  { %865 = vmatpush3.msra.mxu1 %v416_v29 }
 0x1fd   :  { %v299_v1 = vpop.f32.mrf.mxu1 }
 0x1fe   :  { %v300_v2 = vadd.f32 %v640_v63, %v299_v1 }
 0x1ff   :  { %v798_v3 = vpop.f32.mrf.mxu1 }
 0x200   :  { %v304_v4 = vmul.f32 0.044715, %v300_v2  ;;  %v303_v10 = vmul.f32 0.5, %v300_v2 }
 0x202   :  { %v305_v5 = vmul.f32 %v304_v4, %v300_v2 }
 0x204   :  { %v306_v6 = vmul.f32 %v305_v5, %v300_v2 }
 0x206   :  { %v307_v7 = vadd.f32 %v306_v6, %v300_v2 }
 0x208   :  { %v308_v8 = vmul.f32 0.7978846, %v307_v7 }
 0x20a   :  { %916 = vtanh.f32 %v308_v8 }
 0x217   :  { %v917_v9 = vpop.eup %916 }
 0x218   :  { %v310_v11 = vadd.f32 1.0, %v917_v9 }
 0x21a   :  { %v311_v12 = vmul.f32 %v310_v11, %v303_v10  ;;  %v643_v10 = vld [vmem:[%s1285_s10] ss:$0 sm:$0xff] }
 0x21c   :  { %v1223_v13 = vadd.f32 %v311_v12, %v1198_v46  ;;  %v532_v46 = vld [vmem:[#allocation10 + $0x68] sm:$0xff] }
 0x21e   :  { %832 = vmatmul.mubr.f32.vlgmr.msra.gmra.mxu0 %v1223_v13 }
 0x21f   :  { %901 = vmatprep.mubr.msk.f32.mxu0 %vm1060_vm0, %v1059_v0  ;;  %870 = vmatpush3.msra.mxu0 %v534_v44 }
 0x220   :  { %871 = vmatprep.subr.mxu0 %v1059_v0 }
 0x221   :  { %872 = vmatpush3.msra.mxu0 %v533_v45 }
 0x222   :  { %873 = vmatprep.subr.mxu0 %v1059_v0 }
 0x223   :  { %874 = vmatpush3.msra.mxu0 %v532_v46 }
 0x224   :  { %875 = vmatprep.subr.mxu0 %v1059_v0 }
 0x225   :  { %876 = vmatpush3.msra.mxu0 %v531_v47 }
 0x226   :  { %877 = vmatprep.subr.mxu0 %v1059_v0 }
 0x227   :  { %878 = vmatpush3.msra.mxu0 %v530_v48 }
 0x228   :  { %879 = vmatprep.subr.mxu0 %v1059_v0 }
 0x229   :  { %880 = vmatpush3.msra.mxu0 %v529_v49 }
 0x22a   :  { %881 = vmatprep.subr.mxu0 %v1059_v0 }
 0x22b   :  { %882 = vmatpush3.msra.mxu0 %v528_v50 }
 0x22c   :  { %883 = vmatprep.subr.mxu0 %v1059_v0 }
 0x22d   :  { %884 = vmatpush3.msra.mxu0 %v527_v51 }
 0x22e   :  { %885 = vmatprep.subr.mxu0 %v1059_v0 }
 0x22f   :  { %886 = vmatpush3.msra.mxu0 %v526_v52 }
 0x230   :  { %887 = vmatprep.subr.mxu0 %v1059_v0 }
 0x231   :  { %888 = vmatpush3.msra.mxu0 %v525_v53 }
 0x232   :  { %889 = vmatprep.subr.mxu0 %v1059_v0 }
 0x233   :  { %890 = vmatpush3.msra.mxu0 %v524_v54 }
 0x234   :  { %891 = vmatprep.subr.mxu0 %v1059_v0 }
 0x235   :  { %892 = vmatpush3.msra.mxu0 %v523_v55 }
 0x236   :  { %893 = vmatprep.subr.mxu0 %v1059_v0 }
 0x237   :  { %894 = vmatpush3.msra.mxu0 %v522_v56 }
 0x238   :  { %895 = vmatprep.subr.mxu0 %v1059_v0 }
 0x239   :  { %896 = vmatpush3.msra.mxu0 %v521_v57 }
 0x23a   :  { %897 = vmatprep.subr.mxu0 %v1059_v0 }
 0x23b   :  { %898 = vmatpush3.msra.mxu0 %v520_v58 }
 0x23c   :  { %899 = vmatprep.subr.mxu0 %v1059_v0 }
 0x23d   :  { %900 = vmatpush3.msra.mxu0 %v519_v59 }
 0x2de   :  { %v402_v31 = vpop.f32.mrf.mxu0 }
 0x2df   :  { %v403_v32 = vadd.f32 %v641_v30, %v402_v31 }
 0x2e0   :  { %v833_v33 = vpop.f32.mrf.mxu0 }
 0x2e1   :  { %v407_v34 = vmul.f32 0.044715, %v403_v32  ;;  %v406_v40 = vmul.f32 0.5, %v403_v32 }
 0x2e3   :  { %v408_v35 = vmul.f32 %v407_v34, %v403_v32 }
 0x2e5   :  { %v409_v36 = vmul.f32 %v408_v35, %v403_v32 }
 0x2e7   :  { %v410_v37 = vadd.f32 %v409_v36, %v403_v32 }
 0x2e9   :  { %v411_v38 = vmul.f32 0.7978846, %v410_v37 }
 0x2eb   :  { %918 = vtanh.f32 %v411_v38 }
 0x2f8   :  { %v919_v39 = vpop.eup %918 }
 0x2f9   :  { %v413_v41 = vadd.f32 1.0, %v919_v39 }
 0x2fb   :  { %v414_v42 = vmul.f32 %v413_v41, %v406_v40 }
 0x2fd   :  { %v1247_v43 = vadd.f32 %v414_v42, %v1223_v13 }
 0x2ff   :  { %867 = vmatmul.mubr.f32.vlgmr.msra.gmra.mxu1 %v1247_v43 }
 0x3bf   :  { %v505_v61 = vpop.f32.mrf.mxu1 }
 0x3c0   :  { %v506_v62 = vadd.f32 %v642_v60, %v505_v61 }
 0x3c1   :  { %v868_v63 = vpop.f32.mrf.mxu1 }
 0x3c2   :  { %v510_v1 = vmul.f32 0.044715, %v506_v62  ;;  %v509_v7 = vmul.f32 0.5, %v506_v62 }
 0x3c4   :  { %v511_v2 = vmul.f32 %v510_v1, %v506_v62 }
 0x3c6   :  { %v512_v3 = vmul.f32 %v511_v2, %v506_v62 }
 0x3c8   :  { %v513_v4 = vadd.f32 %v512_v3, %v506_v62 }
 0x3ca   :  { %v514_v5 = vmul.f32 0.7978846, %v513_v4 }
 0x3cc   :  { %920 = vtanh.f32 %v514_v5 }
 0x3d9   :  { %v921_v6 = vpop.eup %920 }
 0x3da   :  { %v516_v8 = vadd.f32 1.0, %v921_v6 }
 0x3dc   :  { %v517_v9 = vmul.f32 %v516_v8, %v509_v7 }
 0x3de   :  { %v518_v0 = vadd.f32 %v517_v9, %v1247_v43 }
 0x3e0   :  { %902 = vmatmul.mubr.f32.vlgmr.msra.gmra.mxu0 %v518_v0 }
 0x4a0   :  { %v608_v11 = vpop.f32.mrf.mxu0 }
 0x4a1   :  { %v609_v12 = vadd.f32 %v643_v10, %v608_v11 }
 0x4a2   :  { %v903_v13 = vpop.f32.mrf.mxu0 }
 0x4a3   :  { %v613_v14 = vmul.f32 0.044715, %v609_v12  ;;  %v612_v20 = vmul.f32 0.5, %v609_v12 }
 0x4a5   :  { %v614_v15 = vmul.f32 %v613_v14, %v609_v12 }
 0x4a7   :  { %v615_v16 = vmul.f32 %v614_v15, %v609_v12 }
 0x4a9   :  { %v616_v17 = vadd.f32 %v615_v16, %v609_v12 }
 0x4ab   :  { %v617_v18 = vmul.f32 0.7978846, %v616_v17 }
 0x4ad   :  { %922 = vtanh.f32 %v617_v18 }
 0x4ba   :  { %v923_v19 = vpop.eup %922 }
 0x4bb   :  { %v619_v21 = vadd.f32 1.0, %v923_v19 }
 0x4bd   :  { %v620_v22 = vmul.f32 %v619_v21, %v612_v20 }
 0x4bf   :  { %621 = vst [vmem:[#allocation11] sm:$0xff] %v620_v22 }
 0x4c0   :  { %1035 = shalt.err (!%p1032_p1)
}
 0x4c1   :  { %631 = dma.vmem_to_hbm [thread:$0]  %s629_s28, 128, %s1286_s11, [#allocation4]  }
 0x4c2   :  { %1050 = dma.done.wait [#allocation4], 128  }
 0x4c3   :  { %1051 = vsyncadd [#allocation4], 4294967168 }
 0x4c4   :  { %635 = vsyncpa [#allocation3], 1 }
 0x4c5   :  { %636 = vsyncpa [#allocation6], 1 }
 0x4c6   :  { %637 = vsyncpa [#allocation9], 1 }
 0x4c7   :  { %638 = vsyncpa [#allocation4], 1 }

</bundles_post_ra>
